<compile_context>
chip_gen: v5e
topology: v5e:2x2
jax: 0.10.0
libtpu: 0.0.40
codegen_flags: <defaults>
</compile_context>

<pallas_src>
import jax
import jax.numpy as jnp
from jax.experimental import pallas as pl
from jax.experimental.pallas import tpu as pltpu


def _odefunc_kernel(t_ref, x_ref, e_ref, w_ref, b_ref, out_ref):
    """Fused  dx/dt = tanh((sum_l E_l @ x) @ W + t*b) - x  in one invocation.

    t_ref : SMEM (1, 1) f32 scalar time
    x_ref : VMEM [N, D]   f32 node features
    e_ref : VMEM [N, L*N] bf16 concatenated propagation matrices
    w_ref : VMEM [D, D]   bf16 feature transform
    b_ref : VMEM [1, D]   f32 bias
    """
    x = x_ref[...]                                   # [N, D] f32 (kept for decay term)
    n, d = x_ref.shape
    L = e_ref.shape[1] // n                          # static

    # Single fused MXU contraction over K = L*N (instead of L separate dots).
    xs = jnp.concatenate([x] * L, axis=0).astype(jnp.bfloat16)        # [L*N, D]
    acc = jnp.dot(e_ref[...], xs, preferred_element_type=jnp.float32)  # [N, D] f32

    # Feature transform + time-scaled bias + nonlinearity + decay term.
    t = t_ref[0, 0]
    h = jnp.dot(acc.astype(jnp.bfloat16), w_ref[...],
                preferred_element_type=jnp.float32) + t * b_ref[...]
    out_ref[...] = (jnp.tanh(h) - x).astype(out_ref.dtype)


def make_ode_func_wrapper(e_stack, w, b):
    """One-time parameter prep; returns the per-step forward(t, x) callable.

    e_stack: [L, N, N] stacked E_list (row-normalized propagation matrices)
    w:       [D, D]
    b:       [1, D]
    """
    L, N, _ = e_stack.shape
    D = w.shape[0]

    # Hoisted out of the hot path: E_cat[i, l*N + j] = E_l[i, j], bf16 casts.
    e_cat = jnp.transpose(jnp.asarray(e_stack, jnp.float32), (1, 0, 2)) \
                .reshape(N, L * N).astype(jnp.bfloat16)                 # [N, L*N]
    w_bf = jnp.asarray(w, jnp.bfloat16)                                 # [D, D]
    b_f32 = jnp.asarray(b, jnp.float32)                                 # [1, D]

    cost = pl.CostEstimate(
        flops=2 * N * (L * N) * D + 2 * N * D * D + 4 * N * D,
        transcendentals=N * D,
        bytes_accessed=(2 * N * L * N      # E_cat (bf16)
                        + 2 * D * D        # W (bf16)
                        + 4 * N * D        # x in (f32)
                        + 4 * D + 4        # b, t
                        + 4 * N * D),      # out (f32)
    )

    smem = pl.BlockSpec(memory_space=pltpu.MemorySpace.SMEM)
    vmem = pl.BlockSpec(memory_space=pltpu.MemorySpace.VMEM)

    call = pl.pallas_call(
        _odefunc_kernel,
        out_shape=jax.ShapeDtypeStruct((N, D), jnp.float32),
        in_specs=[smem, vmem, vmem, vmem, vmem],
        out_specs=vmem,
        cost_estimate=cost,
    )

    @jax.jit
    def forward(t, x):
        t_arr = jnp.asarray(t, jnp.float32).reshape(1, 1)
        return call(t_arr, jnp.asarray(x, jnp.float32), e_cat, w_bf, b_f32)

    return forward


def _reference(t, x, e_stack, w, b):
    prop = jnp.einsum("lij,jd->id", e_stack, x)
    h = prop @ w + t * b
    return jnp.tanh(h) - x


if __name__ == "__main__":
    key = jax.random.PRNGKey(0)
    k_x, k_e, k_w, k_b = jax.random.split(key, 4)

    N, D, L = 16, 32, 2  # nodes, hidden, number of E matrices in E_list

    # Node features (the `x` passed to forward).
    x = jax.random.normal(k_x, (N, D), dtype=jnp.float32)

    # E_list: row-normalized non-negative propagation matrices.
    e_raw = jax.random.uniform(k_e, (L, N, N), dtype=jnp.float32)
    e_stack = e_raw / jnp.sum(e_raw, axis=-1, keepdims=True)

    # Deterministic parameter init (xavier-uniform-like W, uniform b).
    limit = jnp.sqrt(6.0 / (D + D))
    w = jax.random.uniform(k_w, (D, D), minval=-limit, maxval=limit,
                           dtype=jnp.float32)
    b = jax.random.uniform(k_b, (1, D), minval=-0.1, maxval=0.1,
                           dtype=jnp.float32)

    t = 0.5

    forward = make_ode_func_wrapper(e_stack, w, b)
    out = forward(t, x)
    out = jax.block_until_ready(out)

    ref = _reference(t, x, e_stack, w, b)
    assert out.shape == (N, D)
    # bf16 MXU inputs (f32 accumulate / epilogue): tolerance loosened vs. f32.
    assert jnp.allclose(out, ref, atol=3e-2, rtol=3e-2)

    print("KERNEL_OK")
</pallas_src>

<mosaic_0001>
module attributes {stable_mosaic.version = 11 : i64} {
  func.func @_odefunc_kernel(%arg0: memref<1x1xf32, #tpu.memory_space<smem>>, %arg1: memref<16x32xf32, #tpu.memory_space<vmem>>, %arg2: memref<16x32xbf16, #tpu.memory_space<vmem>>, %arg3: memref<32x32xbf16, #tpu.memory_space<vmem>>, %arg4: memref<1x32xf32, #tpu.memory_space<vmem>>, %arg5: memref<16x32xf32, #tpu.memory_space<vmem>>) attributes {dimension_semantics = [], scalar_prefetch = 0 : i64, scratch_operands = 0 : i64, tpu.core_type = #tpu.core_type<tc>} {
    %c0 = arith.constant 0 : index
    %c0_0 = arith.constant 0 : index
    %0 = vector.load %arg1[%c0, %c0_0] : memref<16x32xf32, #tpu.memory_space<vmem>>, vector<16x32xf32>
    %1 = tpu.concatenate %0, %0 in 0 : vector<16x32xf32>, vector<16x32xf32> -> vector<32x32xf32>
    %2 = arith.truncf %1 : vector<32x32xf32> to vector<32x32xbf16>
    %c0_1 = arith.constant 0 : index
    %c0_2 = arith.constant 0 : index
    %3 = vector.load %arg2[%c0_1, %c0_2] : memref<16x32xbf16, #tpu.memory_space<vmem>>, vector<16x32xbf16>
    %cst = arith.constant dense<0.000000e+00> : vector<16x32xf32>
    %4 = tpu.matmul %3, %2, %cst {dimension_numbers = #tpu.dot_dimension_numbers<[1], [0], [0], [1], [0, 0, 1, 1], [], []>} : vector<16x32xbf16>, vector<32x32xbf16>, vector<16x32xf32> -> vector<16x32xf32>
    %c0_3 = arith.constant 0 : index
    %c0_4 = arith.constant 0 : index
    %5 = memref.load %arg0[%c0_3, %c0_4] : memref<1x1xf32, #tpu.memory_space<smem>>
    %6 = arith.truncf %4 : vector<16x32xf32> to vector<16x32xbf16>
    %c0_5 = arith.constant 0 : index
    %c0_6 = arith.constant 0 : index
    %7 = vector.load %arg3[%c0_5, %c0_6] : memref<32x32xbf16, #tpu.memory_space<vmem>>, vector<32x32xbf16>
    %cst_7 = arith.constant dense<0.000000e+00> : vector<16x32xf32>
    %8 = tpu.matmul %6, %7, %cst_7 {dimension_numbers = #tpu.dot_dimension_numbers<[1], [0], [0], [1], [0, 0, 1, 1], [], []>} : vector<16x32xbf16>, vector<32x32xbf16>, vector<16x32xf32> -> vector<16x32xf32>
    %c0_8 = arith.constant 0 : index
    %c0_9 = arith.constant 0 : index
    %9 = vector.load %arg4[%c0_8, %c0_9] : memref<1x32xf32, #tpu.memory_space<vmem>>, vector<1x32xf32>
    %10 = vector.broadcast %5 : f32 to vector<1x32xf32>
    %11 = arith.mulf %10, %9 : vector<1x32xf32>
    %12 = vector.broadcast %11 : vector<1x32xf32> to vector<16x32xf32>
    %13 = arith.addf %8, %12 : vector<16x32xf32>
    %14 = math.tanh %13 : vector<16x32xf32>
    %15 = arith.subf %14, %0 : vector<16x32xf32>
    %c0_10 = arith.constant 0 : index
    %c0_11 = arith.constant 0 : index
    %16 = vector.load %arg5[%c0_10, %c0_11] : memref<16x32xf32, #tpu.memory_space<vmem>>, vector<16x32xf32>
    tpu.vector_store %arg5[%c0_10, %c0_11], %15 {strides = array<i32>} : memref<16x32xf32, #tpu.memory_space<vmem>>, vector<16x32xf32>,
    return
  }
}

</mosaic_0001>

<bundles_post_ra>
// kernel: forward.1
= control target key start
LH: loop header
LB: loop body
LE: loop exit
PB: predicated region body
PF: predicated region fallthrough
CT: control target
= control target key end

     0   :  { %11 = vsyncpa [#allocation4], 0  ;;  %s362_s0 = inlined_call_operand.<no memory space> [shape: f32[1,1], index: 0, kind: input, shape index: {}]   ;;  %s363_s1 = inlined_call_operand.hbm [shape: f32[16,32], index: 1, kind: input, shape index: {}]   ;;  %s364_s2 = inlined_call_operand.hbm [shape: bf16[16,32], index: 2, kind: input, shape index: {}]   ;;  %s365_s3 = inlined_call_operand.hbm [shape: bf16[32,32], index: 3, kind: input, shape index: {}]   ;;  %s366_s4 = inlined_call_operand.vmem [shape: f32[1,32], index: 4, kind: input, shape index: {}]   ;;  %s367_s5 = inlined_call_operand.hbm [shape: f32[16,32], index: 5, kind: output, shape index: {}]  }
   0x1   :  { %12 = vsyncpa [#allocation7], 0  ;;  %s33_s20 = sshll.u32 %s364_s2, 4  ;;  %s34_s20 = int_to_ptr.hbm [resolvable:$true] %s33_s20 }
   0x2   :  { %13 = vsyncpa [#allocation5], 0  ;;  %s296_s21 = smov [#allocation6]   ;;  %s20_s25 = sshll.u32 %s363_s1, 4  ;;  %s21_s25 = int_to_ptr.hbm [resolvable:$true] %s20_s25 }
   0x3   :  { %s35_s22 = sshll.u32 %s296_s21, 4  ;;  %s297_s26 = smov 64   ;;  %s36_s22 = int_to_ptr.vmem [resolvable:$true] %s35_s22 }
   0x4   :  { %s298_s27 = smov 4   ;;  %s299_s28 = smov [#allocation3]  }
   0x5   :  { %41 = dma.hbm_to_vmem [thread:$0]  %s34_s20, 128, %s36_s22, [#allocation7], %s297_s26, %s297_s26, %s298_s27  }
   0x6   :  { %s22_s29 = sshll.u32 %s299_s28, 4  ;;  %s300_s30 = smov 128   ;;  %s23_s29 = int_to_ptr.vmem [resolvable:$true] %s22_s29 }
   0x7   :  { %s301_s6 = smov 8   ;;  %s46_s8 = sshll.u32 %s365_s3, 4  ;;  %s47_s8 = int_to_ptr.hbm [resolvable:$true] %s46_s8 }
   0x8   :  { %28 = dma.hbm_to_vmem [thread:$0]  %s21_s25, 256, %s23_s29, [#allocation4], %s300_s30, %s300_s30, %s301_s6  }
   0x9   :  { %s302_s9 = smov [#allocation8]  }
   0xa   :  { %s48_s1 = sshll.u32 %s302_s9, 4  ;;  %s49_s1 = int_to_ptr.vmem [resolvable:$true] %s48_s1 }
   0xb   :  { %54 = dma.hbm_to_vmem [thread:$0]  %s47_s8, 256, %s49_s1, [#allocation7], %s297_s26, %s297_s26, %s298_s27  }
   0xc   :  { %290 = dma.done.wait [#allocation4], 256  }
   0xd   :  { %291 = vsyncadd [#allocation4], 4294967040 }
   0xe   :  { %292 = dma.done.wait [#allocation7], 384  }
   0xf   :  { %293 = vsyncadd [#allocation7], 4294966912  ;;  %v70_v0 = vld [vmem:[#allocation3] sm:$0xff]  ;;  %v71_v1 = vld [vmem:[#allocation3 + $0x8] sm:$0xff]  ;;  %vm80_vm0 = vcmask 261120   ;;  %v105_v10 = vstv %s362_s0  ;;  %s303_s13 = smov [#allocation9]  }
  0x10   :  { %v72_v2 = vpack.c.bf16 %v71_v1, %v70_v0  ;;  %v179_v3 = vld [vmem:[#allocation6] sm:$0xff]  ;;  %v181_v4 = vld [vmem:[#allocation8 + $0x8] sm:$0xff]  ;;  %v180_v5 = vld [vmem:[#allocation8] sm:$0xff]  ;;  %s149_s14 = sshll.u32 %s303_s13, 4  ;;  %s151_s16 = sshll.u32 %s367_s5, 4  ;;  %s150_s14 = int_to_ptr.vmem [resolvable:$true] %s149_s14  ;;  %s152_s16 = int_to_ptr.hbm [resolvable:$true] %s151_s16 }
  0x11   :  { %131 = vmatpush.bf16.msra.mxu1 %v181_v4  ;;  %v104_v9 = vld [vmem:[%s366_s4] sm:$0x1] }
  0x12   :  { %90 = vmatpush.bf16.msra.mxu0 %v72_v2  ;;  %v106_v11 = vmul.f32 %v105_v10, %v104_v9 }
  0x14   :  { %v108_v12 = vperm.slane %v106_v11, 0 }
  0x15   :  { %132 = vmatpush.bf16.msra.mxu1 %v180_v5 }
  0x16   :  { %91 = vmatpush.bf16.msra.mxu0 %v72_v2 }
  0x19   :  { %169 = vmatmul.msk.bf16.vlgmr.msra.gmra.mxu0 %vm80_vm0, %v179_v3 }
  0x96   :  { %v93_v6 = vpop.f32.mrf.mxu0 }
  0x9e   :  { %v95_v7 = vpop.f32.mrf.mxu0 }
  0x9f   :  { %v99_v8 = vpack.c.bf16 %v95_v7, %v93_v6 }
  0xa1   :  { %178 = vmatmul.msk.bf16.vlgmr.msra.gmra.mxu1 %vm80_vm0, %v99_v8 }
 0x11e   :  { %v134_v13 = vpop.f32.mrf.mxu1 }
 0x11f   :  { %v135_v14 = vadd.f32 %v134_v13, %v108_v12 }
 0x121   :  { %190 = vtanh.f32 %v135_v14 }
 0x126   :  { %v136_v15 = vpop.f32.mrf.mxu1 }
 0x127   :  { %v191_v16 = vpop.eup %190  ;;  %v137_v17 = vadd.f32 %v136_v15, %v108_v12 }
 0x128   :  { %v141_v18 = vsub.f32 %v191_v16, %v70_v0 }
 0x129   :  { %192 = vtanh.f32 %v137_v17 }
 0x12a   :  { %143 = vst.msk [vmem:[#allocation9] sm:$0xff] %vm80_vm0, %v141_v18 }
 0x12f   :  { %v193_v19 = vpop.eup %192 }
 0x130   :  { %v142_v20 = vsub.f32 %v193_v19, %v71_v1 }
 0x132   :  { %144 = vst.msk [vmem:[#allocation9 + $0x8] sm:$0xff] %vm80_vm0, %v142_v20 }
 0x133   :  { %157 = dma.vmem_to_hbm [thread:$0]  %s150_s14, 256, %s152_s16, [#allocation5], %s300_s30, %s300_s30, %s301_s6  }
 0x134   :  { %294 = dma.done.wait [#allocation5], 256  }
 0x135   :  { %295 = vsyncadd [#allocation5], 4294967040 }
 0x136   :  { %162 = vsyncpa [#allocation4], 1 }
 0x137   :  { %163 = vsyncpa [#allocation7], 1 }
 0x138   :  { %164 = vsyncpa [#allocation5], 1 }

</bundles_post_ra>
